<compile_context>
chip_gen: v5e
topology: v5e:2x2
jax: 0.10.0
libtpu: 0.0.40
codegen_flags: <defaults>
</compile_context>

<pallas_src>
import functools

import jax
import jax.numpy as jnp
from jax.experimental import pallas as pl
from jax.experimental.pallas import tpu as pltpu


def _attention2_kernel(x_ref, w1_ref, b1_ref, w2t_ref, b2_ref, out_ref, *,
                       apply_softmax):
    """Processes Bt bags per grid step.

    x_ref  : (Bt, N, L)  f32 or bf16
    w1_ref : (L, D)      f32 or bf16
    b1_ref : (1, D)      f32
    w2t_ref: (K, D)      f32   (second Linear's weight, pre-transposed)
    b2_ref : (K, 1)      f32
    out_ref: (Bt, K, N)  f32   per-bag attention weights, lane-dense over N
    """
    Bt, N, L = x_ref.shape
    K, D = w2t_ref.shape

    # ---- Linear(L->D) + tanh: one fat MXU matmul over all Bt*N instance rows
    # (f32 accumulation), EUP tanh.
    xf = x_ref[...].reshape(Bt * N, L)
    h = jnp.tanh(
        jnp.dot(xf, w1_ref[...], preferred_element_type=jnp.float32)
        + b1_ref[...]
    )                                   # (Bt*N, D) f32
    h3 = h.reshape(Bt, N, D)            # pure major-dim split (N % 8 == 0 here)

    # ---- Linear(D->K), emitted directly in (Bt, K, N) orientation so the
    # output store is lane-dense over the instance axis and no transpose is
    # needed in the kernel or the wrapper.
    w2t_b = jnp.broadcast_to(w2t_ref[...][None], (Bt, K, D))
    logits = jnp.einsum("bkd,bnd->bkn", w2t_b, h3,
                        preferred_element_type=jnp.float32)
    logits = logits + b2_ref[...].reshape(1, K, 1)          # (Bt, K, N)

    if apply_softmax:
        # Numerically stable softmax over N (the lane axis here), per bag.
        m = jnp.max(logits, axis=2, keepdims=True)
        e = jnp.exp(logits - m)
        s = jnp.sum(e, axis=2, keepdims=True)
        out = e * pl.reciprocal(s, approx=False)   # exact: keeps 1e-5 tolerance
    else:
        out = logits
    out_ref[...] = out.astype(out_ref.dtype)


def _pick_bags_per_step(B, N, L, D, K, x_esize, w_esize,
                        target_rows=256, vmem_budget=16 * 1024 * 1024):
    """Largest divisor of B giving >= target_rows matmul rows that fits VMEM."""
    bt = min(B, max(1, pl.cdiv(target_rows, N)))

    def to_divisor(v):
        while B % v:
            v -= 1
        return v

    def fits(v):
        xb = 2 * v * N * L * x_esize                 # double-buffered x tile
        ob = 2 * v * K * N * 4                       # double-buffered out tile
        wb = 2 * (L * D * w_esize + (D + K * D + K) * 4)   # resident params
        work = 4 * v * N * (D + K) * 4               # live intermediates (rough)
        return xb + ob + wb + work <= vmem_budget

    bt = to_divisor(bt)
    while bt > 1 and not fits(bt):
        bt = to_divisor(bt - 1)
    return bt


def attention2_forward_batched(x, w1, b1, w2, b2, isNorm=True,
                               use_bf16_matmul=False):
    """x: (B, N, L).  Returns (B, K, N): Attention2.forward applied per bag."""
    B, N, L = x.shape
    D = w1.shape[1]
    K = w2.shape[1]

    if use_bf16_matmul:
        # bf16 MXU inputs, f32 accumulation: ~2-3x MXU throughput and half the
        # x/w1 HBM+VMEM bytes on v6e/v7x.  Post-matmul math stays f32 (v5e has
        # no bf16 VPU/EUP).  Tolerance ~1e-2 instead of 1e-5.
        x = x.astype(jnp.bfloat16)
        w1 = w1.astype(jnp.bfloat16)
    else:
        x = x.astype(jnp.float32)
        w1 = w1.astype(jnp.float32)

    w2t = jnp.transpose(w2).astype(jnp.float32)     # (K, D)
    b1_2d = b1.reshape(1, D).astype(jnp.float32)
    b2_2d = b2.reshape(K, 1).astype(jnp.float32)

    x_esize = jnp.dtype(x.dtype).itemsize
    w_esize = jnp.dtype(w1.dtype).itemsize
    Bt = _pick_bags_per_step(B, N, L, D, K, x_esize, w_esize)
    grid = (B // Bt,)

    kernel = functools.partial(_attention2_kernel, apply_softmax=bool(isNorm))

    cost = pl.CostEstimate(
        flops=2 * B * N * (L * D + D * K),
        transcendentals=B * N * D,                  # tanh (+ exp is tiny)
        bytes_accessed=(B * N * L * x_esize + L * D * w_esize
                        + (D + K * D + K) * 4 + B * K * N * 4),
    )

    # Raise the scoped-VMEM limit only when large L/D actually needs it
    # (v7x: 64 MiB physical / 32 MiB default; v5e default scoped is 16 MiB).
    est_vmem = (2 * Bt * N * L * x_esize + 2 * Bt * K * N * 4
                + 2 * (L * D * w_esize + (D + K * D + K) * 4)
                + 4 * Bt * N * (D + K) * 4)
    vmem_limit = (int(min(est_vmem * 2, 64 * 1024 * 1024))
                  if est_vmem > 16 * 1024 * 1024 else None)

    out = pl.pallas_call(
        kernel,
        out_shape=jax.ShapeDtypeStruct((B, K, N), jnp.float32),
        grid=grid,
        in_specs=[
            pl.BlockSpec((Bt, N, L), lambda b: (b, 0, 0)),   # Bt bags per step
            pl.BlockSpec((L, D), lambda b: (0, 0)),          # resident weights
            pl.BlockSpec((1, D), lambda b: (0, 0)),
            pl.BlockSpec((K, D), lambda b: (0, 0)),
            pl.BlockSpec((K, 1), lambda b: (0, 0)),
        ],
        out_specs=pl.BlockSpec((Bt, K, N), lambda b: (b, 0, 0)),
        compiler_params=pltpu.CompilerParams(
            # Bag tiles are independent; "parallel" lets multi-TC parts shard
            # the grid (harmless on single-TC v5e/v6e).
            dimension_semantics=("parallel",),
            vmem_limit_bytes=vmem_limit,
        ),
        cost_estimate=cost,
    )(x, w1, b1_2d, w2t, b2_2d)

    return out   # (B, K, N) -- already in the PyTorch output orientation


def attention2_forward(x, w1, b1, w2, b2, isNorm=True, use_bf16_matmul=False):
    """Single-bag entry matching the PyTorch module: x (N, L) -> (K, N)."""
    return attention2_forward_batched(x[None], w1, b1, w2, b2, isNorm=isNorm,
                                      use_bf16_matmul=use_bf16_matmul)[0]


def _reference(x, w1, b1, w2, b2, isNorm=True):
    """Pure-JAX reference for correctness check."""
    a = jnp.tanh(x @ w1 + b1) @ w2 + b2   # (N, K)
    A = a.T                               # (K, N)
    return jax.nn.softmax(A, axis=1) if isNorm else A


if __name__ == "__main__":
    # Module defaults L=512, D=128, K=1; small bag size N and batch of bags B.
    B, N, L, D, K = 2, 16, 512, 128, 1

    key = jax.random.PRNGKey(0)
    kx, kw1, kb1, kw2, kb2 = jax.random.split(key, 5)

    x  = jax.random.normal(kx,  (B, N, L), dtype=jnp.float32)
    w1 = jax.random.normal(kw1, (L, D), dtype=jnp.float32) * 0.05
    b1 = jax.random.normal(kb1, (D,),   dtype=jnp.float32) * 0.05
    w2 = jax.random.normal(kw2, (D, K), dtype=jnp.float32) * 0.05
    b2 = jax.random.normal(kb2, (K,),   dtype=jnp.float32) * 0.05

    ref = jax.vmap(lambda xb: _reference(xb, w1, b1, w2, b2, True))(x)

    # Batched path (softmax), f32.
    out = jax.block_until_ready(
        attention2_forward_batched(x, w1, b1, w2, b2, isNorm=True))
    assert out.shape == (B, K, N), out.shape
    assert jnp.allclose(out, ref, atol=1e-5, rtol=1e-5)

    # Single-bag path, matching the PyTorch forward signature exactly.
    out1 = jax.block_until_ready(
        attention2_forward(x[0], w1, b1, w2, b2, isNorm=True))
    assert out1.shape == (K, N), out1.shape
    assert jnp.allclose(out1, ref[0], atol=1e-5, rtol=1e-5)

    # isNorm=False branch (raw transposed logits, no softmax).
    out_raw = jax.block_until_ready(
        attention2_forward(x[0], w1, b1, w2, b2, isNorm=False))
    ref_raw = _reference(x[0], w1, b1, w2, b2, False)
    assert jnp.allclose(out_raw, ref_raw, atol=1e-4, rtol=1e-4)

    # bf16 MXU-input path (looser tolerance, f32 accumulation).
    out_bf16 = jax.block_until_ready(
        attention2_forward_batched(x, w1, b1, w2, b2, isNorm=True,
                                   use_bf16_matmul=True))
    assert jnp.allclose(out_bf16, ref, atol=2e-2, rtol=2e-2)

    # Multi-step grid + general K sanity check (B=40 bags, K=4).
    B2, K2 = 40, 4
    kx2, kw22, kb22 = jax.random.split(jax.random.PRNGKey(1), 3)
    x2  = jax.random.normal(kx2,  (B2, N, L), dtype=jnp.float32)
    w2b = jax.random.normal(kw22, (D, K2), dtype=jnp.float32) * 0.05
    b2b = jax.random.normal(kb22, (K2,),   dtype=jnp.float32) * 0.05
    ref2 = jax.vmap(lambda xb: _reference(xb, w1, b1, w2b, b2b, True))(x2)
    out2 = jax.block_until_ready(
        attention2_forward_batched(x2, w1, b1, w2b, b2b, isNorm=True))
    assert out2.shape == (B2, K2, N), out2.shape
    assert jnp.allclose(out2, ref2, atol=1e-5, rtol=1e-5)

    print("KERNEL_OK")
</pallas_src>

<mosaic_0001>
module attributes {stable_mosaic.version = 11 : i64} {
  func.func @_attention2_kernel(%arg0: i32, %arg1: memref<2x16x512xf32, #tpu.memory_space<vmem>>, %arg2: memref<512x128xf32, #tpu.memory_space<vmem>>, %arg3: memref<1x128xf32, #tpu.memory_space<vmem>>, %arg4: memref<1x128xf32, #tpu.memory_space<vmem>>, %arg5: memref<1x1xf32, #tpu.memory_space<vmem>>, %arg6: memref<2x1x16xf32, #tpu.memory_space<vmem>>) attributes {dimension_semantics = [#tpu.dimension_semantics<parallel>], iteration_bounds = array<i64: 1>, scalar_prefetch = 0 : i64, scratch_operands = 0 : i64, tpu.core_type = #tpu.core_type<tc>, window_params = [{transform_indices = @transform_0, window_bounds = array<i64: 2, 16, 512>}, {pipeline_mode = #tpu.pipeline_mode<synchronous>, transform_indices = @transform_1, window_bounds = array<i64: 512, 128>}, {pipeline_mode = #tpu.pipeline_mode<synchronous>, transform_indices = @transform_2, window_bounds = array<i64: 1, 128>}, {pipeline_mode = #tpu.pipeline_mode<synchronous>, transform_indices = @transform_3, window_bounds = array<i64: 1, 128>}, {pipeline_mode = #tpu.pipeline_mode<synchronous>, transform_indices = @transform_4, window_bounds = array<i64: 1, 1>}, {transform_indices = @transform_5, window_bounds = array<i64: 2, 1, 16>}]} {
    %c0 = arith.constant 0 : index
    %c0_0 = arith.constant 0 : index
    %c0_1 = arith.constant 0 : index
    %0 = vector.load %arg1[%c0, %c0_0, %c0_1] : memref<2x16x512xf32, #tpu.memory_space<vmem>>, vector<2x16x512xf32>
    %1 = vector.shape_cast %0 : vector<2x16x512xf32> to vector<32x512xf32>
    %c0_2 = arith.constant 0 : index
    %c0_3 = arith.constant 0 : index
    %2 = vector.load %arg2[%c0_2, %c0_3] : memref<512x128xf32, #tpu.memory_space<vmem>>, vector<512x128xf32>
    %cst = arith.constant dense<0.000000e+00> : vector<32x128xf32>
    %3 = tpu.matmul %1, %2, %cst {dimension_numbers = #tpu.dot_dimension_numbers<[1], [0], [0], [1], [0, 0, 1, 1], [], []>} : vector<32x512xf32>, vector<512x128xf32>, vector<32x128xf32> -> vector<32x128xf32>
    %c0_4 = arith.constant 0 : index
    %c0_5 = arith.constant 0 : index
    %4 = vector.load %arg3[%c0_4, %c0_5] : memref<1x128xf32, #tpu.memory_space<vmem>>, vector<1x128xf32>
    %5 = vector.broadcast %4 : vector<1x128xf32> to vector<32x128xf32>
    %6 = arith.addf %3, %5 : vector<32x128xf32>
    %7 = math.tanh %6 : vector<32x128xf32>
    %8 = vector.shape_cast %7 : vector<32x128xf32> to vector<2x16x128xf32>
    %c0_6 = arith.constant 0 : index
    %c0_7 = arith.constant 0 : index
    %9 = vector.load %arg4[%c0_6, %c0_7] : memref<1x128xf32, #tpu.memory_space<vmem>>, vector<1x128xf32>
    %10 = vector.shape_cast %9 : vector<1x128xf32> to vector<1x1x128xf32>
    %11 = vector.shape_cast %10 : vector<1x1x128xf32> to vector<1x1x128xf32>
    %12 = vector.broadcast %11 : vector<1x1x128xf32> to vector<2x1x128xf32>
    "tpu.trace_start"() <{level = 10 : i32, message = "bkd,bnd->bkn"}> : () -> ()
    %cst_8 = arith.constant dense<0.000000e+00> : vector<2x1x16xf32>
    %13 = tpu.matmul %12, %8, %cst_8 {dimension_numbers = #tpu.dot_dimension_numbers<[2], [2], [1], [1], [0, 0, 0, 1, 1, 1], [0], [0]>} : vector<2x1x128xf32>, vector<2x16x128xf32>, vector<2x1x16xf32> -> vector<2x1x16xf32>
    "tpu.trace_stop"() : () -> ()
    %c0_9 = arith.constant 0 : index
    %c0_10 = arith.constant 0 : index
    %14 = vector.load %arg5[%c0_9, %c0_10] : memref<1x1xf32, #tpu.memory_space<vmem>>, vector<1x1xf32>
    %15 = vector.shape_cast %14 : vector<1x1xf32> to vector<1x1x1xf32>
    %16 = vector.broadcast %15 : vector<1x1x1xf32> to vector<2x1x16xf32>
    %17 = arith.addf %13, %16 : vector<2x1x16xf32>
    %cst_11 = arith.constant dense<0xFF800000> : vector<2x1xf32>
    %18 = vector.multi_reduction <maximumf>, %17, %cst_11 [2] : vector<2x1x16xf32> to vector<2x1xf32>
    %19 = vector.shape_cast %18 : vector<2x1xf32> to vector<2x1x1xf32>
    %20 = vector.broadcast %19 : vector<2x1x1xf32> to vector<2x1x16xf32>
    %21 = arith.subf %17, %20 : vector<2x1x16xf32>
    %22 = math.exp %21 : vector<2x1x16xf32>
    %cst_12 = arith.constant dense<0.000000e+00> : vector<2x1xf32>
    %23 = vector.multi_reduction <add>, %22, %cst_12 [2] : vector<2x1x16xf32> to vector<2x1xf32>
    %24 = vector.shape_cast %23 : vector<2x1xf32> to vector<2x1x1xf32>
    %25 = tpu.reciprocal %24 : vector<2x1x1xf32> -> vector<2x1x1xf32>
    %26 = vector.broadcast %25 : vector<2x1x1xf32> to vector<2x1x16xf32>
    %27 = arith.mulf %22, %26 : vector<2x1x16xf32>
    %c0_13 = arith.constant 0 : index
    %c0_14 = arith.constant 0 : index
    %c0_15 = arith.constant 0 : index
    %28 = vector.load %arg6[%c0_13, %c0_14, %c0_15] : memref<2x1x16xf32, #tpu.memory_space<vmem>>, vector<2x1x16xf32>
    tpu.vector_store %arg6[%c0_13, %c0_14, %c0_15], %27 {strides = array<i32>} : memref<2x1x16xf32, #tpu.memory_space<vmem>>, vector<2x1x16xf32>,
    return
  }
  func.func @transform_0(%arg0: i32) -> (i32, i32, i32) {
    %c0_i32 = arith.constant 0 : i32
    %c0_i32_0 = arith.constant 0 : i32
    %c0_i32_1 = arith.constant 0 : i32
    return %arg0, %c0_i32, %c0_i32_0 : i32, i32, i32
  }
  func.func @transform_1(%arg0: i32) -> (i32, i32) {
    %c0_i32 = arith.constant 0 : i32
    %c0_i32_0 = arith.constant 0 : i32
    %c0_i32_1 = arith.constant 0 : i32
    return %c0_i32, %c0_i32_0 : i32, i32
  }
  func.func @transform_2(%arg0: i32) -> (i32, i32) {
    %c0_i32 = arith.constant 0 : i32
    %c0_i32_0 = arith.constant 0 : i32
    %c0_i32_1 = arith.constant 0 : i32
    return %c0_i32, %c0_i32_0 : i32, i32
  }
  func.func @transform_3(%arg0: i32) -> (i32, i32) {
    %c0_i32 = arith.constant 0 : i32
    %c0_i32_0 = arith.constant 0 : i32
    %c0_i32_1 = arith.constant 0 : i32
    return %c0_i32, %c0_i32_0 : i32, i32
  }
  func.func @transform_4(%arg0: i32) -> (i32, i32) {
    %c0_i32 = arith.constant 0 : i32
    %c0_i32_0 = arith.constant 0 : i32
    %c0_i32_1 = arith.constant 0 : i32
    return %c0_i32, %c0_i32_0 : i32, i32
  }
  func.func @transform_5(%arg0: i32) -> (i32, i32, i32) {
    %c0_i32 = arith.constant 0 : i32
    %c0_i32_0 = arith.constant 0 : i32
    %c0_i32_1 = arith.constant 0 : i32
    return %arg0, %c0_i32, %c0_i32_0 : i32, i32, i32
  }
}

</mosaic_0001>

<bundles_post_ra>
// kernel: tpu_custom_call.1
= control target key start
LH: loop header
LB: loop body
LE: loop exit
PB: predicated region body
PF: predicated region fallthrough
CT: control target
= control target key end

     0   :  { %s548_s0 = inlined_call_operand.hbm [shape: f32[2,16,512], index: 0, kind: input, shape index: {}]   ;;  %s549_s1 = inlined_call_operand.hbm [shape: f32[512,128], index: 1, kind: input, shape index: {}]   ;;  %s550_s2 = inlined_call_operand.vmem [shape: f32[1,128], index: 2, kind: input, shape index: {}]   ;;  %s551_s3 = inlined_call_operand.vmem [shape: f32[1,128], index: 3, kind: input, shape index: {}]   ;;  %s552_s4 = inlined_call_operand.<no memory space> [shape: f32[1,1], index: 4, kind: input, shape index: {}]   ;;  %s553_s5 = inlined_call_operand.hbm [shape: f32[2,1,16], index: 5, kind: output, shape index: {}]  }
   0x1   :  { %v10_v0 = vstv %s552_s4 }
   0x2   :  { %11 = vst [vmem:[#allocation2] sm:$0x1] %v10_v0 }
   0x3   :  { %12 = vsyncpa [#allocation4], 0 }
   0x4   :  { %13 = vsyncpa [#allocation7], 0 }
   0x5   :  { %14 = vsyncpa [#allocation5], 0  ;;  %s19_s22 = sshll.u32 %s548_s0, 4  ;;  %s484_s23 = smov [#allocation3]   ;;  %s20_s22 = int_to_ptr.hbm [resolvable:$true] %s19_s22 }
   0x6   :  { %s21_s24 = sshll.u32 %s484_s23, 4  ;;  %s32_s27 = sshll.u32 %s549_s1, 4  ;;  %s22_s24 = int_to_ptr.vmem [resolvable:$true] %s21_s24  ;;  %s33_s27 = int_to_ptr.hbm [resolvable:$true] %s32_s27 }
   0x7   :  { %s485_s28 = smov 512   ;;  %s486_s29 = smov 32  }
   0x8   :  { %27 = dma.hbm_to_vmem [thread:$0]  %s20_s22, 2048, %s22_s24, [#allocation4], %s485_s28, %s485_s28, %s486_s29  }
   0x9   :  { %s487_s4 = smov [#allocation6]   ;;  %s488_s6 = smov 128  }
   0xa   :  { %s34_s30 = sshll.u32 %s487_s4, 4  ;;  %s489_s7 = smov 8   ;;  %s35_s30 = int_to_ptr.vmem [resolvable:$true] %s34_s30 }
   0xb   :  { %40 = dma.hbm_to_vmem [thread:$0]  %s33_s27, 8192, %s35_s30, [#allocation7], %s488_s6, %s488_s6, %s489_s7  }
   0xc   :  { %478 = dma.done.wait [#allocation4], 2048  }
   0xd   :  { %479 = vsyncadd [#allocation4], 4294965248 }
   0xe   :  { %480 = dma.done.wait [#allocation7], 8192  }
   0xf   :  { %481 = vsyncadd [#allocation7], 4294959104  ;;  %v118_v1 = vld [vmem:[#allocation6 + $0x178] sm:$0xff]  ;;  %v117_v3 = vld [vmem:[#allocation6 + $0x170] sm:$0xff]  ;;  %vm307_vm0 = vcmask 122880   ;;  %s364_s12 = sshll.u32 %s553_s5, 4  ;;  %s365_s12 = int_to_ptr.hbm [resolvable:$true] %s364_s12 }
  0x10   :  { %v86_v2 = vld [vmem:[#allocation6 + $0x78] sm:$0xff]  ;;  %197 = vmatpush.msra.mxu2 %v118_v1  ;;  %v85_v5 = vld [vmem:[#allocation6 + $0x70] sm:$0xff]  ;;  %v116_v7 = vld [vmem:[#allocation6 + $0x168] sm:$0xff]  ;;  %s492_s13 = smov 16   ;;  %s493_s14 = smov 1  }
  0x11   :  { %139 = vmatpush.msra.mxu0 %v86_v2  ;;  %v134_v4 = vld [vmem:[#allocation6 + $0x1f8] sm:$0xff]  ;;  %v133_v8 = vld [vmem:[#allocation6 + $0x1f0] sm:$0xff]  ;;  %v84_v9 = vld [vmem:[#allocation6 + $0x68] sm:$0xff] }
  0x12   :  { %v102_v6 = vld [vmem:[#allocation6 + $0xf8] sm:$0xff]  ;;  %226 = vmatpush.msra.mxu3 %v134_v4  ;;  %198 = vmatpush.msra.mxu2 %v117_v3  ;;  %v101_v10 = vld [vmem:[#allocation6 + $0xf0] sm:$0xff]  ;;  %v132_v11 = vld [vmem:[#allocation6 + $0x1e8] sm:$0xff] }
  0x13   :  { %168 = vmatpush.msra.mxu1 %v102_v6  ;;  %140 = vmatpush.msra.mxu0 %v85_v5  ;;  %v115_v12 = vld [vmem:[#allocation6 + $0x160] sm:$0xff]  ;;  %v100_v14 = vld [vmem:[#allocation6 + $0xe8] sm:$0xff]  ;;  %v114_v17 = vld [vmem:[#allocation6 + $0x158] sm:$0xff] }
  0x14   :  { %227 = vmatpush.msra.mxu3 %v133_v8  ;;  %v83_v13 = vld [vmem:[#allocation6 + $0x60] sm:$0xff]  ;;  %199 = vmatpush.msra.mxu2 %v116_v7  ;;  %v82_v18 = vld [vmem:[#allocation6 + $0x58] sm:$0xff]  ;;  %v113_v21 = vld [vmem:[#allocation6 + $0x150] sm:$0xff] }
  0x15   :  { %169 = vmatpush.msra.mxu1 %v101_v10  ;;  %141 = vmatpush.msra.mxu0 %v84_v9  ;;  %v131_v15 = vld [vmem:[#allocation6 + $0x1e0] sm:$0xff]  ;;  %v130_v19 = vld [vmem:[#allocation6 + $0x1d8] sm:$0xff]  ;;  %v81_v22 = vld [vmem:[#allocation6 + $0x50] sm:$0xff] }
  0x16   :  { %v99_v16 = vld [vmem:[#allocation6 + $0xe0] sm:$0xff]  ;;  %228 = vmatpush.msra.mxu3 %v132_v11  ;;  %200 = vmatpush.msra.mxu2 %v115_v12  ;;  %v98_v20 = vld [vmem:[#allocation6 + $0xd8] sm:$0xff]  ;;  %v129_v23 = vld [vmem:[#allocation6 + $0x1d0] sm:$0xff] }
  0x17   :  { %170 = vmatpush.msra.mxu1 %v100_v14  ;;  %142 = vmatpush.msra.mxu0 %v83_v13  ;;  %v97_v24 = vld [vmem:[#allocation6 + $0xd0] sm:$0xff]  ;;  %v112_v25 = vld [vmem:[#allocation6 + $0x148] sm:$0xff]  ;;  %v111_v29 = vld [vmem:[#allocation6 + $0x140] sm:$0xff] }
  0x18   :  { %229 = vmatpush.msra.mxu3 %v131_v15  ;;  %201 = vmatpush.msra.mxu2 %v114_v17  ;;  %v80_v26 = vld [vmem:[#allocation6 + $0x48] sm:$0xff]  ;;  %v79_v30 = vld [vmem:[#allocation6 + $0x40] sm:$0xff]  ;;  %v110_v33 = vld [vmem:[#allocation6 + $0x138] sm:$0xff] }
  0x19   :  { %171 = vmatpush.msra.mxu1 %v99_v16  ;;  %143 = vmatpush.msra.mxu0 %v82_v18  ;;  %v128_v27 = vld [vmem:[#allocation6 + $0x1c8] sm:$0xff]  ;;  %v127_v31 = vld [vmem:[#allocation6 + $0x1c0] sm:$0xff]  ;;  %v78_v34 = vld [vmem:[#allocation6 + $0x38] sm:$0xff] }
  0x1a   :  { %230 = vmatpush.msra.mxu3 %v130_v19  ;;  %202 = vmatpush.msra.mxu2 %v113_v21  ;;  %v96_v28 = vld [vmem:[#allocation6 + $0xc8] sm:$0xff]  ;;  %v95_v32 = vld [vmem:[#allocation6 + $0xc0] sm:$0xff]  ;;  %v126_v35 = vld [vmem:[#allocation6 + $0x1b8] sm:$0xff]  ;;  %v490_v21 = vmov 0  }
  0x1b   :  { %172 = vmatpush.msra.mxu1 %v98_v20  ;;  %144 = vmatpush.msra.mxu0 %v81_v22  ;;  %v94_v36 = vld [vmem:[#allocation6 + $0xb8] sm:$0xff]  ;;  %v109_v37 = vld [vmem:[#allocation6 + $0x130] sm:$0xff]  ;;  %v108_v41 = vld [vmem:[#allocation6 + $0x128] sm:$0xff] }
  0x1c   :  { %231 = vmatpush.msra.mxu3 %v129_v23  ;;  %203 = vmatpush.msra.mxu2 %v112_v25  ;;  %v77_v38 = vld [vmem:[#allocation6 + $0x30] sm:$0xff]  ;;  %v76_v42 = vld [vmem:[#allocation6 + $0x28] sm:$0xff]  ;;  %v107_v45 = vld [vmem:[#allocation6 + $0x120] sm:$0xff] }
  0x1d   :  { %173 = vmatpush.msra.mxu1 %v97_v24  ;;  %145 = vmatpush.msra.mxu0 %v80_v26  ;;  %v125_v39 = vld [vmem:[#allocation6 + $0x1b0] sm:$0xff]  ;;  %v124_v43 = vld [vmem:[#allocation6 + $0x1a8] sm:$0xff]  ;;  %v75_v46 = vld [vmem:[#allocation6 + $0x20] sm:$0xff] }
  0x1e   :  { %232 = vmatpush.msra.mxu3 %v128_v27  ;;  %204 = vmatpush.msra.mxu2 %v111_v29  ;;  %v93_v40 = vld [vmem:[#allocation6 + $0xb0] sm:$0xff]  ;;  %v92_v44 = vld [vmem:[#allocation6 + $0xa8] sm:$0xff]  ;;  %v123_v47 = vld [vmem:[#allocation6 + $0x1a0] sm:$0xff] }
  0x1f   :  { %174 = vmatpush.msra.mxu1 %v96_v28  ;;  %146 = vmatpush.msra.mxu0 %v79_v30  ;;  %v91_v48 = vld [vmem:[#allocation6 + $0xa0] sm:$0xff]  ;;  %v106_v49 = vld [vmem:[#allocation6 + $0x118] sm:$0xff]  ;;  %v105_v53 = vld [vmem:[#allocation6 + $0x110] sm:$0xff] }
  0x20   :  { %233 = vmatpush.msra.mxu3 %v127_v31  ;;  %205 = vmatpush.msra.mxu2 %v110_v33  ;;  %v74_v50 = vld [vmem:[#allocation6 + $0x18] sm:$0xff]  ;;  %v73_v54 = vld [vmem:[#allocation6 + $0x10] sm:$0xff]  ;;  %v104_v57 = vld [vmem:[#allocation6 + $0x108] sm:$0xff] }
  0x21   :  { %175 = vmatpush.msra.mxu1 %v95_v32  ;;  %147 = vmatpush.msra.mxu0 %v78_v34  ;;  %v122_v51 = vld [vmem:[#allocation6 + $0x198] sm:$0xff]  ;;  %v121_v55 = vld [vmem:[#allocation6 + $0x190] sm:$0xff]  ;;  %v72_v58 = vld [vmem:[#allocation6 + $0x8] sm:$0xff] }
  0x22   :  { %234 = vmatpush.msra.mxu3 %v126_v35  ;;  %206 = vmatpush.msra.mxu2 %v109_v37  ;;  %v90_v52 = vld [vmem:[#allocation6 + $0x98] sm:$0xff]  ;;  %v89_v56 = vld [vmem:[#allocation6 + $0x90] sm:$0xff]  ;;  %v120_v59 = vld [vmem:[#allocation6 + $0x188] sm:$0xff] }
  0x23   :  { %176 = vmatpush.msra.mxu1 %v94_v36  ;;  %148 = vmatpush.msra.mxu0 %v77_v38  ;;  %v88_v60 = vld [vmem:[#allocation6 + $0x88] sm:$0xff]  ;;  %v103_v61 = vld [vmem:[#allocation6 + $0x100] sm:$0xff]  ;;  %v57_v63 = vld [vmem:[#allocation3 + $0x10] sm:$0xff] }
  0x24   :  { %235 = vmatpush.msra.mxu3 %v125_v39  ;;  %207 = vmatpush.msra.mxu2 %v108_v41  ;;  %v71_v62 = vld [vmem:[#allocation6] sm:$0xff]  ;;  %v58_v2 = vld [vmem:[#allocation3 + $0x18] sm:$0xff]  ;;  %v56_v4 = vld [vmem:[#allocation3 + $0x8] sm:$0xff] }
  0x25   :  { %177 = vmatpush.msra.mxu1 %v93_v40  ;;  %149 = vmatpush.msra.mxu0 %v76_v42  ;;  %v119_v0 = vld [vmem:[#allocation6 + $0x180] sm:$0xff]  ;;  %v61_v5 = vld [vmem:[#allocation3 + $0x30] sm:$0xff]  ;;  %v62_v7 = vld [vmem:[#allocation3 + $0x38] sm:$0xff] }
  0x26   :  { %236 = vmatpush.msra.mxu3 %v124_v43  ;;  %208 = vmatpush.msra.mxu2 %v107_v45  ;;  %v55_v1 = vld [vmem:[#allocation3] sm:$0xff]  ;;  %v60_v8 = vld [vmem:[#allocation3 + $0x28] sm:$0xff]  ;;  %v65_v9 = vld [vmem:[#allocation3 + $0x50] sm:$0xff] }
  0x27   :  { %178 = vmatpush.msra.mxu1 %v92_v44  ;;  %150 = vmatpush.msra.mxu0 %v75_v46  ;;  %v87_v3 = vld [vmem:[#allocation6 + $0x80] sm:$0xff]  ;;  %v66_v11 = vld [vmem:[#allocation3 + $0x58] sm:$0xff]  ;;  %v64_v12 = vld [vmem:[#allocation3 + $0x48] sm:$0xff] }
  0x28   :  { %237 = vmatpush.msra.mxu3 %v123_v47  ;;  %209 = vmatpush.msra.mxu2 %v106_v49  ;;  %v59_v6 = vld [vmem:[#allocation3 + $0x20] sm:$0xff]  ;;  %v69_v13 = vld [vmem:[#allocation3 + $0x70] sm:$0xff]  ;;  %v70_v15 = vld [vmem:[#allocation3 + $0x78] sm:$0xff] }
  0x29   :  { %179 = vmatpush.msra.mxu1 %v91_v48  ;;  %151 = vmatpush.msra.mxu0 %v74_v50  ;;  %v63_v10 = vld [vmem:[#allocation3 + $0x40] sm:$0xff]  ;;  %v68_v16 = vld [vmem:[#allocation3 + $0x68] sm:$0xff]  ;;  %v389_v18 = vld [vmem:[%s550_s2] ss:$0 sm:$0xff] }
  0x2a   :  { %238 = vmatpush.msra.mxu3 %v122_v51  ;;  %210 = vmatpush.msra.mxu2 %v105_v53  ;;  %v67_v14 = vld [vmem:[#allocation3 + $0x60] sm:$0xff]  ;;  %v260_v20 = vld [vmem:[#allocation2] sm:$0x1] }
  0x2b   :  { %180 = vmatpush.msra.mxu1 %v90_v52  ;;  %152 = vmatpush.msra.mxu0 %v73_v54  ;;  %v259_v49 = vld [vmem:[%s551_s3] sm:$0x1]  ;;  %s491_s3 = smov [#allocation8]  }
  0x2c   :  { %239 = vmatpush.msra.mxu3 %v121_v55  ;;  %211 = vmatpush.msra.mxu2 %v104_v57  ;;  %s362_s9 = sshll.u32 %s491_s3, 4  ;;  %s363_s9 = int_to_ptr.vmem [resolvable:$true] %s362_s9 }
  0x2d   :  { %181 = vmatpush.msra.mxu1 %v89_v56  ;;  %153 = vmatpush.msra.mxu0 %v72_v58 }
  0x2e   :  { %240 = vmatpush.msra.mxu3 %v120_v59  ;;  %212 = vmatpush.msra.mxu2 %v103_v61 }
  0x2f   :  { %182 = vmatpush.msra.mxu1 %v88_v60  ;;  %154 = vmatpush.msra.mxu0 %v71_v62 }
  0x30   :  { %213 = vmatmul.f32.vlgmr.msra.gmra.mxu2 %v57_v63  ;;  %241 = vmatpush.msra.mxu3 %v119_v0 }
  0x31   :  { %155 = vmatmul.f32.vlgmr.msra.gmra.mxu0 %v55_v1  ;;  %242 = vmatmul.f32.vlgmr.msra.gmra.mxu3 %v58_v2 }
  0x32   :  { %183 = vmatpush.msra.mxu1 %v87_v3  ;;  %388 = vset.pattern.permute.xlu0 %v490_v21 }
  0x33   :  { %184 = vmatmul.f32.vlgmr.msra.gmra.mxu1 %v56_v4  ;;  %263 = vperm.xlu0 %388, %v260_v20  }
  0x38   :  { %216 = vmatmul.f32.gmra.mxu2 %v61_v5 }
  0x39   :  { %158 = vmatmul.f32.gmra.mxu0 %v59_v6  ;;  %245 = vmatmul.f32.gmra.mxu3 %v62_v7 }
  0x3b   :  { %187 = vmatmul.f32.gmra.mxu1 %v60_v8 }
  0x40   :  { %219 = vmatmul.f32.gmra.mxu2 %v65_v9 }
  0x41   :  { %161 = vmatmul.f32.gmra.mxu0 %v63_v10  ;;  %248 = vmatmul.f32.gmra.mxu3 %v66_v11 }
  0x43   :  { %190 = vmatmul.f32.gmra.mxu1 %v64_v12 }
  0x48   :  { %222 = vmatmul.f32.gmra.mxu2 %v69_v13 }
  0x49   :  { %164 = vmatmul.f32.gmra.mxu0 %v67_v14  ;;  %251 = vmatmul.f32.gmra.mxu3 %v70_v15 }
  0x4b   :  { %193 = vmatmul.f32.gmra.mxu1 %v68_v16 }
  0xa5   :  { %v264_v57 = vpop.permute.xlu0 %263 }
  0xa6   :  { %v266_v58 = vperm.slane %v264_v57, 0 }
  0xae   :  { %v156_v17 = vpop.f32.mrf.mxu0 }
  0xaf   :  { %v157_v23 = vadd.f32 %v389_v18, %v156_v17 }
  0xb0   :  { %v185_v19 = vpop.f32.mrf.mxu1 }
  0xb1   :  { %v186_v27 = vadd.f32 %v185_v19, %v157_v23 }
  0xb3   :  { %v214_v22 = vpop.f32.mrf.mxu2 }
  0xb4   :  { %v243_v24 = vpop.f32.mrf.mxu3  ;;  %v215_v31 = vadd.f32 %v214_v22, %v186_v27 }
  0xb6   :  { %v159_v25 = vpop.f32.mrf.mxu0  ;;  %v244_v36 = vadd.f32 %v243_v24, %v215_v31 }
  0xb7   :  { %v160_v26 = vadd.f32 %v389_v18, %v159_v25 }
  0xb8   :  { %v188_v28 = vpop.f32.mrf.mxu1 }
  0xb9   :  { %v189_v29 = vadd.f32 %v188_v28, %v160_v26 }
  0xbb   :  { %v217_v30 = vpop.f32.mrf.mxu2 }
  0xbc   :  { %v218_v32 = vadd.f32 %v217_v30, %v189_v29  ;;  %v246_v33 = vpop.f32.mrf.mxu3 }
  0xbe   :  { %v247_v34 = vadd.f32 %v246_v33, %v218_v32  ;;  %v162_v35 = vpop.f32.mrf.mxu0 }
  0xbf   :  { %v163_v39 = vadd.f32 %v389_v18, %v162_v35 }
  0xc0   :  { %390 = vtanh.f32 %v247_v34  ;;  %v191_v37 = vpop.f32.mrf.mxu1 }
  0xc1   :  { %392 = vtanh.f32 %v244_v36  ;;  %v192_v44 = vadd.f32 %v191_v37, %v163_v39 }
  0xc3   :  { %v220_v38 = vpop.f32.mrf.mxu2 }
  0xc4   :  { %v249_v40 = vpop.f32.mrf.mxu3  ;;  %v221_v50 = vadd.f32 %v220_v38, %v192_v44 }
  0xc6   :  { %v391_v41 = vpop.eup %390  ;;  %v165_v42 = vpop.f32.mrf.mxu0  ;;  %v250_v54 = vadd.f32 %v249_v40, %v221_v50 }
  0xc7   :  { %v166_v43 = vadd.f32 %v389_v18, %v165_v42  ;;  %281 = vmatpush.xpose.msrb.mxu0 %v391_v41  ;;  %v393_v47 = vpop.eup %392 }
  0xc8   :  { %v194_v45 = vpop.f32.mrf.mxu1 }
  0xc9   :  { %v195_v46 = vadd.f32 %v194_v45, %v166_v43 }
  0xcb   :  { %v223_v48 = vpop.f32.mrf.mxu2  ;;  %282 = vmatpush.xpose.msrb.mxu0 %v393_v47 }
  0xcc   :  { %v224_v51 = vadd.f32 %v223_v48, %v195_v46  ;;  %v252_v52 = vpop.f32.mrf.mxu3 }
  0xce   :  { %v253_v53 = vadd.f32 %v252_v52, %v224_v51  ;;  %283 = vmatmul.f32.vlgmr.msrb.gmra.mxu0 %v259_v49 }
  0xd0   :  { %394 = vtanh.f32 %v253_v53 }
  0xd1   :  { %396 = vtanh.f32 %v250_v54 }
  0xd6   :  { %v395_v55 = vpop.eup %394 }
  0xd7   :  { %301 = vmatpush.xpose.msrb.mxu1 %v395_v55  ;;  %v397_v56 = vpop.eup %396 }
  0xdb   :  { %302 = vmatpush.xpose.msrb.mxu1 %v397_v56 }
  0xde   :  { %303 = vmatmul.f32.vlgmr.msrb.gmra.mxu1 %v259_v49 }
 0x14b   :  { %v284_v59 = vpop.f32.mrf.mxu0 }
 0x14c   :  { %v285_v60 = vadd.f32 %v284_v59, %v266_v58 }
 0x14e   :  { %v308_v61 = vsel %vm307_vm0, %v285_v60, -inf }
 0x14f   :  { %309 = vmax.xlane.f32.xlu0 %v308_v61 }
 0x15b   :  { %v304_v62 = vpop.f32.mrf.mxu1 }
 0x15c   :  { %v305_v63 = vadd.f32 %v304_v62, %v266_v58 }
 0x15e   :  { %v311_v0 = vsel %vm307_vm0, %v305_v63, -inf }
 0x15f   :  { %312 = vmax.xlane.f32.xlu1 %v311_v0 }
 0x1c2   :  { %v310_v1 = vpop.xlane.xlu0 %309 }
 0x1c3   :  { %v314_v2 = vsub.f32 %v285_v60, %v310_v1 }
 0x1c5   :  { %v316_v3 = vmul.f32 1.442695, %v314_v2 }
 0x1c7   :  { %398 = vpow2.f32 %v316_v3 }
 0x1cd   :  { %v399_v4 = vpop.eup %398 }
 0x1ce   :  { %v320_v5 = vsel %vm307_vm0, %v399_v4, 0.0 }
 0x1cf   :  { %321 = vadd.xlane.f32.xlu1 %v320_v5 }
 0x1d2   :  { %v313_v6 = vpop.xlane.xlu1 %312 }
 0x1d3   :  { %v315_v7 = vsub.f32 %v305_v63, %v313_v6 }
 0x1d5   :  { %v318_v8 = vmul.f32 1.442695, %v315_v7 }
 0x1d7   :  { %400 = vpow2.f32 %v318_v8 }
 0x1dd   :  { %v401_v9 = vpop.eup %400 }
 0x1de   :  { %v323_v10 = vsel %vm307_vm0, %v401_v9, 0.0 }
 0x1df   :  { %324 = vadd.xlane.f32.xlu2 %v323_v10 }
 0x242   :  { %v322_v11 = vpop.xlane.xlu1 %321 }
 0x243   :  { %402 = vrcp.f32 %v322_v11  ;;  %v337_v15 = vand.u32 2147483648, %v322_v11  ;;  %v335_v17 = vand.u32 2147483647, %v322_v11  ;;  %vm331_vm2 = vweird.f32 %v322_v11 }
 0x245   :  { %v338_v19 = vor.u32 1.1754944e-38, %v337_v15  ;;  %vm336_vm4 = vcmp.eq.f32.partialorder %v335_v17, 8.507059e+37 }
 0x249   :  { %v403_v12 = vpop.eup %402 }
 0x24a   :  { %v327_v13 = vmul.f32 %v403_v12, %v322_v11  ;;  %vm332_vm1 = vweird.f32 %v403_v12 }
 0x24b   :  { %vm333_vm3 = vmor %vm331_vm2, %vm332_vm1 }
 0x24c   :  { %v328_v14 = vsub.f32 1.0, %v327_v13 }
 0x24e   :  { %v329_v16 = vmul.f32 %v403_v12, %v328_v14 }
 0x250   :  { %v330_v18 = vadd.f32 %v403_v12, %v329_v16 }
 0x252   :  { %v334_v20 = vsel %vm333_vm3, %v403_v12, %v330_v18  ;;  %v325_v21 = vpop.xlane.xlu2 %324 }
 0x253   :  { %v339_v22 = vsel %vm336_vm4, %v338_v19, %v334_v20  ;;  %404 = vrcp.f32 %v325_v21  ;;  %v351_v27 = vand.u32 2147483648, %v325_v21  ;;  %v349_v29 = vand.u32 2147483647, %v325_v21 }
 0x254   :  { %v354_v23 = vmul.f32 %v399_v4, %v339_v22  ;;  %vm345_vm6 = vweird.f32 %v325_v21 }
 0x255   :  { %v352_v31 = vor.u32 1.1754944e-38, %v351_v27  ;;  %vm350_vm8 = vcmp.eq.f32.partialorder %v349_v29, 8.507059e+37 }
 0x256   :  { %356 = vst.msk [vmem:[#allocation8] sm:$0x1] %vm307_vm0, %v354_v23 }
 0x259   :  { %v405_v24 = vpop.eup %404 }
 0x25a   :  { %v341_v25 = vmul.f32 %v405_v24, %v325_v21  ;;  %vm346_vm5 = vweird.f32 %v405_v24 }
 0x25b   :  { %vm347_vm7 = vmor %vm345_vm6, %vm346_vm5 }
 0x25c   :  { %v342_v26 = vsub.f32 1.0, %v341_v25 }
 0x25e   :  { %v343_v28 = vmul.f32 %v405_v24, %v342_v26 }
 0x260   :  { %v344_v30 = vadd.f32 %v405_v24, %v343_v28 }
 0x262   :  { %v348_v32 = vsel %vm347_vm7, %v405_v24, %v344_v30 }
 0x263   :  { %v353_v33 = vsel %vm350_vm8, %v352_v31, %v348_v32 }
 0x264   :  { %v355_v34 = vmul.f32 %v401_v9, %v353_v33 }
 0x266   :  { %357 = vst.msk [vmem:[#allocation8 + $0x1] sm:$0x1] %vm307_vm0, %v355_v34 }
 0x267   :  { %370 = dma.vmem_to_hbm [thread:$0]  %s363_s9, 32, %s365_s12, [#allocation5], %s492_s13, %s492_s13, %s493_s14  }
 0x268   :  { %482 = dma.done.wait [#allocation5], 32  }
 0x269   :  { %483 = vsyncadd [#allocation5], 4294967264 }
 0x26a   :  { %375 = vsyncpa [#allocation4], 1 }
 0x26b   :  { %376 = vsyncpa [#allocation7], 1 }
 0x26c   :  { %377 = vsyncpa [#allocation5], 1 }

</bundles_post_ra>
